<compile_context>
chip_gen: v7x
topology: tpu7x:2x2x1
jax: 0.10.0
libtpu: 0.0.40
codegen_flags: <defaults>
</compile_context>

<pallas_src>
import functools
from typing import NamedTuple

import jax
import jax.numpy as jnp
from jax.experimental import pallas as pl
from jax.experimental.pallas import tpu as pltpu

_INV_SQRT2 = 0.7071067811865476
_LANE = 128
_BIAS_ROWS = 8  # (1, X) blocks pad to 8 sublanes in VMEM


def _round_up(x, m):
    return (x + m - 1) // m * m


def _gelu_exact(x):
    # Matches torch.nn.GELU() default (erf-based, not tanh approximation).
    return 0.5 * x * (1.0 + jax.lax.erf(x * _INV_SQRT2))


# --------------------------------------------------------------------------
# Kernels
# --------------------------------------------------------------------------

def mlp_kernel_resident(x_ref, w1_ref, b1_ref, w2_ref, b2_ref, o_ref):
    """n_h == 1: whole (padded) hidden dim resident. No accumulator scratch.

    x_ref : (tm, D_in_p)     bf16
    w1_ref: (D_in_p, H_p)    bf16   b1_ref: (1, H_p)    f32
    w2_ref: (H_p, D_out_p)   bf16   b2_ref: (1, D_out_p) f32
    o_ref : (tm, D_out_p)    out_dtype
    """
    h = jnp.dot(x_ref[...], w1_ref[...], preferred_element_type=jnp.float32)
    h = _gelu_exact(h + b1_ref[...])
    o_ref[...] = (jnp.dot(h.astype(jnp.bfloat16), w2_ref[...],
                          preferred_element_type=jnp.float32)
                  + b2_ref[...]).astype(o_ref.dtype)
    # Dropout(p=0.0) is the identity -> nothing to apply.


def mlp_kernel_chunked(x_ref, w1_ref, b1_ref, w2_ref, b2_ref, o_ref, acc_ref):
    """n_h > 1: hidden dim chunked on a trailing 'arbitrary' grid axis.

    Per grid step (i = token tile, k = hidden chunk):
    x_ref : (tm, D_in_p)   bf16
    w1_ref: (D_in_p, th)   bf16   b1_ref: (1, th)       f32
    w2_ref: (th, D_out_p)  bf16   b2_ref: (1, D_out_p)  f32
    o_ref : (tm, D_out_p)  out_dtype
    acc   : (tm, D_out_p)  f32 accumulator over the hidden-chunk axis
    """
    k = pl.program_id(1)

    h = jnp.dot(x_ref[...], w1_ref[...], preferred_element_type=jnp.float32)
    h = _gelu_exact(h + b1_ref[...])
    p = jnp.dot(h.astype(jnp.bfloat16), w2_ref[...],
                preferred_element_type=jnp.float32)

    @pl.when(k == 0)
    def _first():
        # Direct store of the first partial product (+ b2): no zero-init pass
        # and no finalize bias add.
        acc_ref[...] = p + b2_ref[...]

    @pl.when(k > 0)
    def _rest():
        acc_ref[...] += p

    @pl.when(k == pl.num_programs(1) - 1)
    def _finalize():
        o_ref[...] = acc_ref[...].astype(o_ref.dtype)


# --------------------------------------------------------------------------
# Configuration / weight packing (done once, outside the per-call forward)
# --------------------------------------------------------------------------

class MlpConfig(NamedTuple):
    D_in: int
    H: int
    D_out: int
    D_in_p: int
    H_p: int
    D_out_p: int
    th: int
    n_h: int
    tm_target: int
    vmem_cap: int
    two_cores: bool


def _tpu_info():
    """Best-effort generation info; safe defaults if queries are unavailable."""
    kind = ""
    try:
        kind = jax.devices()[0].device_kind.lower()
    except Exception:
        pass
    vmem_cap = 128 * 1024 * 1024
    try:
        vmem_cap = int(pltpu.get_tpu_info().vmem_capacity_bytes)
    except Exception:
        if "v7" in kind:
            vmem_cap = 64 * 1024 * 1024
    tm_target = 512 if "v5" in kind else 1024
    two_cores = ("v7" in kind) or (vmem_cap <= 80 * 1024 * 1024)
    return vmem_cap, tm_target, two_cores


def pack_mlp_params(w1, b1, w2, b2):
    """Cast+pad weights once into kernel layout; decide hidden-dim residency.

    w1: (D_in, H), b1: (H,), w2: (H, D_out), b2: (D_out,)  (nn.Linear transposed).
    Returns ((w1p, b1p, w2p, b2p), MlpConfig).
    """
    D_in, H = w1.shape
    D_out = w2.shape[1]
    vmem_cap, tm_target, two_cores = _tpu_info()

    D_in_p = _round_up(D_in, _LANE)
    D_out_p = _round_up(D_out, _LANE)
    H_p128 = _round_up(H, _LANE)

    # Weight-residency heuristic: resident bf16 weights must leave room for the
    # x/out tiles and the (tm, H_p) GELU intermediate.
    resident_bytes = (D_in_p + D_out_p) * H_p128 * 2
    if resident_bytes <= int(0.60 * vmem_cap):
        th = H_p128                       # fully resident, n_h == 1
    else:
        th = min(512, H_p128)             # stream hidden chunks
    H_p = _round_up(H, th)
    n_h = H_p // th

    cfg = MlpConfig(D_in=D_in, H=H, D_out=D_out,
                    D_in_p=D_in_p, H_p=H_p, D_out_p=D_out_p,
                    th=th, n_h=n_h, tm_target=tm_target,
                    vmem_cap=vmem_cap, two_cores=two_cores)

    # Zero padding is exact: GELU(0 + 0) = 0 contributes nothing to fc2.
    w1p = jnp.pad(jnp.asarray(w1, jnp.bfloat16),
                  ((0, D_in_p - D_in), (0, H_p - H)))
    b1p = jnp.pad(jnp.asarray(b1, jnp.float32), (0, H_p - H)).reshape(1, H_p)
    w2p = jnp.pad(jnp.asarray(w2, jnp.bfloat16),
                  ((0, H_p - H), (0, D_out_p - D_out)))
    b2p = jnp.pad(jnp.asarray(b2, jnp.float32),
                  (0, D_out_p - D_out)).reshape(1, D_out_p)
    return (w1p, b1p, w2p, b2p), cfg


def _vmem_footprint(tm, out_itemsize, cfg):
    """Itemized VMEM bytes for a given token tile (no blanket hedging)."""
    w_buf = 1 if cfg.n_h == 1 else 2      # single- vs double-buffered weights
    fp = (2 * tm * cfg.D_in_p * 2                       # x tiles, bf16, dbuf
          + w_buf * cfg.D_in_p * cfg.th * 2             # fc1 weight block(s)
          + w_buf * _BIAS_ROWS * cfg.th * 4             # b1 block(s)
          + w_buf * cfg.th * cfg.D_out_p * 2            # fc2 weight block(s)
          + _BIAS_ROWS * cfg.D_out_p * 4                # b2 (Buffered(1))
          + 2 * tm * cfg.D_out_p * out_itemsize         # out tiles, dbuf
          + tm * cfg.th * (4 + 4 + 2))                  # fc1/GELU temps + bf16 cast
    if cfg.n_h > 1:
        fp += tm * cfg.D_out_p * 4                      # f32 accumulator
    return fp


def _select_tiling(T, out_itemsize, cfg):
    """Pick the largest token tile fitting ~70% of VMEM; return (tm, vmem_limit)."""
    budget = int(0.70 * cfg.vmem_cap)
    t_up = max(8, _round_up(T, 8))
    cands = [c for c in (1024, 768, 512, 384, 256, 128) if c <= cfg.tm_target]
    tm = 128
    for c in cands:
        if _vmem_footprint(c, out_itemsize, cfg) <= budget:
            tm = c
            break
    tm = min(tm, t_up)

    # Megacore (v7x-like): make sure the 'parallel' token axis has >= 2 tiles
    # when there is enough work, so both TensorCores get a share.
    if cfg.two_cores and T >= 2 * _LANE:
        while _round_up(T, tm) // tm < 2 and tm > _LANE:
            tm = max(_LANE, _round_up(tm // 2, _LANE))

    fp = _vmem_footprint(tm, out_itemsize, cfg)
    vmem_limit = int(min(max(int(1.25 * fp), 32 * 1024 * 1024),
                         int(0.90 * cfg.vmem_cap)))
    vmem_limit = max(vmem_limit, fp + (2 << 20))
    return tm, vmem_limit


# --------------------------------------------------------------------------
# Forward
# --------------------------------------------------------------------------

@functools.partial(jax.jit, static_argnames=("cfg",))
def mlp_forward_packed(x, w1p, b1p, w2p, b2p, cfg):
    """x: (..., D_in) -> (..., D_out), using pre-packed (padded bf16) weights."""
    lead = x.shape[:-1]
    T = 1
    for d in lead:
        T *= d
    out_dtype = x.dtype
    out_itemsize = jnp.dtype(out_dtype).itemsize

    tm, vmem_limit = _select_tiling(T, out_itemsize, cfg)
    T_p = _round_up(T, tm)
    n_t = T_p // tm

    x2 = x.reshape(T, cfg.D_in).astype(jnp.bfloat16)
    if T_p != T or cfg.D_in_p != cfg.D_in:
        x2 = jnp.pad(x2, ((0, T_p - T), (0, cfg.D_in_p - cfg.D_in)))

    resident = pl.Buffered(1)   # grid-constant blocks: no wasted double buffer

    if cfg.n_h == 1:
        # Fully VMEM-resident weights: 1-D grid over token tiles, no scratch.
        grid_spec = pltpu.PrefetchScalarGridSpec(
            num_scalar_prefetch=0,
            grid=(n_t,),
            in_specs=[
                pl.BlockSpec((tm, cfg.D_in_p), lambda i: (i, 0)),
                pl.BlockSpec((cfg.D_in_p, cfg.H_p), lambda i: (0, 0),
                             pipeline_mode=resident),
                pl.BlockSpec((1, cfg.H_p), lambda i: (0, 0),
                             pipeline_mode=resident),
                pl.BlockSpec((cfg.H_p, cfg.D_out_p), lambda i: (0, 0),
                             pipeline_mode=resident),
                pl.BlockSpec((1, cfg.D_out_p), lambda i: (0, 0),
                             pipeline_mode=resident),
            ],
            out_specs=pl.BlockSpec((tm, cfg.D_out_p), lambda i: (i, 0)),
            scratch_shapes=[],
        )
        kernel = mlp_kernel_resident
        dims = ("parallel",)
    else:
        # Hidden dim streamed in chunks on a trailing 'arbitrary' axis.
        grid_spec = pltpu.PrefetchScalarGridSpec(
            num_scalar_prefetch=0,
            grid=(n_t, cfg.n_h),
            in_specs=[
                pl.BlockSpec((tm, cfg.D_in_p), lambda i, k: (i, 0)),
                pl.BlockSpec((cfg.D_in_p, cfg.th), lambda i, k: (0, k)),
                pl.BlockSpec((1, cfg.th), lambda i, k: (0, k)),
                pl.BlockSpec((cfg.th, cfg.D_out_p), lambda i, k: (k, 0)),
                pl.BlockSpec((1, cfg.D_out_p), lambda i, k: (0, 0),
                             pipeline_mode=resident),
            ],
            out_specs=pl.BlockSpec((tm, cfg.D_out_p), lambda i, k: (i, 0)),
            scratch_shapes=[pltpu.VMEM((tm, cfg.D_out_p), jnp.float32)],
        )
        kernel = mlp_kernel_chunked
        dims = ("parallel", "arbitrary")

    out2 = pl.pallas_call(
        kernel,
        out_shape=jax.ShapeDtypeStruct((T_p, cfg.D_out_p), out_dtype),
        grid_spec=grid_spec,
        compiler_params=pltpu.CompilerParams(
            dimension_semantics=dims,
            vmem_limit_bytes=vmem_limit,
        ),
    )(x2, w1p, b1p, w2p, b2p)

    if T_p != T or cfg.D_out_p != cfg.D_out:
        out2 = out2[:T, :cfg.D_out]
    return out2.reshape(*lead, cfg.D_out)


def mlp_forward(x, w1, b1, w2, b2):
    """Convenience one-shot API (packs weights per call; prefer pack_mlp_params
    + mlp_forward_packed for repeated calls with fixed weights)."""
    packed, cfg = pack_mlp_params(w1, b1, w2, b2)
    return mlp_forward_packed(x, *packed, cfg=cfg)


def init_mlp_params(key, in_features, hidden_features=None, out_features=None):
    """Deterministic synthetic init; shapes match nn.Linear (stored transposed)."""
    out_features = out_features or in_features
    hidden_features = hidden_features or in_features
    k1, k2, k3, k4 = jax.random.split(key, 4)
    bound1 = 1.0 / jnp.sqrt(in_features)
    bound2 = 1.0 / jnp.sqrt(hidden_features)
    w1 = jax.random.uniform(k1, (in_features, hidden_features), jnp.float32,
                            -bound1, bound1)
    b1 = jax.random.uniform(k2, (hidden_features,), jnp.float32, -bound1, bound1)
    w2 = jax.random.uniform(k3, (hidden_features, out_features), jnp.float32,
                            -bound2, bound2)
    b2 = jax.random.uniform(k4, (out_features,), jnp.float32, -bound2, bound2)
    return w1, b1, w2, b2


if __name__ == "__main__":
    key = jax.random.PRNGKey(0)
    kx, kp = jax.random.split(key)

    B, N, D_in = 2, 8, 32          # batch=2, seq=8, in_features=32
    hidden = 64                    # hidden_features
    D_out = 32                     # out_features defaults to in_features

    x = jax.random.normal(kx, (B, N, D_in), dtype=jnp.float32)
    w1, b1, w2, b2 = init_mlp_params(kp, D_in, hidden, D_out)

    # Hoisted weight cast/pad (done once, reused for every forward call).
    packed, cfg = pack_mlp_params(w1, b1, w2, b2)
    out = mlp_forward_packed(x, *packed, cfg=cfg)
    out = jax.block_until_ready(out)
    assert out.shape == (B, N, D_out)

    # Reference with the same bf16-input / f32-accumulate matmul contract the
    # kernel uses (matches the pure-f32 PyTorch forward to ~1e-2 relative).
    xb = x.reshape(-1, D_in).astype(jnp.bfloat16)
    h_ref = jnp.dot(xb, w1.astype(jnp.bfloat16),
                    preferred_element_type=jnp.float32) + b1
    h_ref = _gelu_exact(h_ref)
    ref = jnp.dot(h_ref.astype(jnp.bfloat16), w2.astype(jnp.bfloat16),
                  preferred_element_type=jnp.float32) + b2
    ref = ref.reshape(B, N, D_out).astype(x.dtype)

    assert jnp.allclose(out, ref, atol=1e-2, rtol=1e-2), \
        float(jnp.max(jnp.abs(out - ref)))

    print("KERNEL_OK")
</pallas_src>

<mosaic_0001>
module attributes {stable_mosaic.version = 11 : i64} {
  func.func @mlp_kernel_resident(%arg0: i32, %arg1: memref<16x128xbf16, #tpu.memory_space<vmem>>, %arg2: memref<128x128xbf16, #tpu.memory_space<vmem>>, %arg3: memref<1x128xf32, #tpu.memory_space<vmem>>, %arg4: memref<128x128xbf16, #tpu.memory_space<vmem>>, %arg5: memref<1x128xf32, #tpu.memory_space<vmem>>, %arg6: memref<16x128xf32, #tpu.memory_space<vmem>>) attributes {dimension_semantics = [#tpu.dimension_semantics<parallel>], iteration_bounds = array<i64: 1>, scalar_prefetch = 0 : i64, scratch_operands = 0 : i64, tpu.core_type = #tpu.core_type<tc>, window_params = [{transform_indices = @transform_0, window_bounds = array<i64: 16, 128>}, {pipeline_mode = #tpu.pipeline_mode<synchronous>, transform_indices = @transform_1, window_bounds = array<i64: 128, 128>}, {pipeline_mode = #tpu.pipeline_mode<synchronous>, transform_indices = @transform_2, window_bounds = array<i64: 1, 128>}, {pipeline_mode = #tpu.pipeline_mode<synchronous>, transform_indices = @transform_3, window_bounds = array<i64: 128, 128>}, {pipeline_mode = #tpu.pipeline_mode<synchronous>, transform_indices = @transform_4, window_bounds = array<i64: 1, 128>}, {transform_indices = @transform_5, window_bounds = array<i64: 16, 128>}]} {
    %c0 = arith.constant 0 : index
    %c0_0 = arith.constant 0 : index
    %0 = vector.load %arg1[%c0, %c0_0] : memref<16x128xbf16, #tpu.memory_space<vmem>>, vector<16x128xbf16>
    %c0_1 = arith.constant 0 : index
    %c0_2 = arith.constant 0 : index
    %1 = vector.load %arg2[%c0_1, %c0_2] : memref<128x128xbf16, #tpu.memory_space<vmem>>, vector<128x128xbf16>
    %cst = arith.constant dense<0.000000e+00> : vector<16x128xf32>
    %2 = tpu.matmul %0, %1, %cst {dimension_numbers = #tpu.dot_dimension_numbers<[1], [0], [0], [1], [0, 0, 1, 1], [], []>} : vector<16x128xbf16>, vector<128x128xbf16>, vector<16x128xf32> -> vector<16x128xf32>
    %c0_3 = arith.constant 0 : index
    %c0_4 = arith.constant 0 : index
    %3 = vector.load %arg3[%c0_3, %c0_4] : memref<1x128xf32, #tpu.memory_space<vmem>>, vector<1x128xf32>
    %4 = vector.broadcast %3 : vector<1x128xf32> to vector<16x128xf32>
    %5 = arith.addf %2, %4 : vector<16x128xf32>
    %cst_5 = arith.constant 5.000000e-01 : f32
    %6 = vector.broadcast %cst_5 : f32 to vector<16x128xf32>
    %7 = arith.mulf %6, %5 : vector<16x128xf32>
    %cst_6 = arith.constant 0.707106769 : f32
    %8 = vector.broadcast %cst_6 : f32 to vector<16x128xf32>
    %9 = arith.mulf %5, %8 : vector<16x128xf32>
    %10 = math.erf %9 : vector<16x128xf32>
    %cst_7 = arith.constant 1.000000e+00 : f32
    %11 = vector.broadcast %cst_7 : f32 to vector<16x128xf32>
    %12 = arith.addf %11, %10 : vector<16x128xf32>
    %13 = arith.mulf %7, %12 : vector<16x128xf32>
    %14 = arith.truncf %13 : vector<16x128xf32> to vector<16x128xbf16>
    %c0_8 = arith.constant 0 : index
    %c0_9 = arith.constant 0 : index
    %15 = vector.load %arg4[%c0_8, %c0_9] : memref<128x128xbf16, #tpu.memory_space<vmem>>, vector<128x128xbf16>
    %cst_10 = arith.constant dense<0.000000e+00> : vector<16x128xf32>
    %16 = tpu.matmul %14, %15, %cst_10 {dimension_numbers = #tpu.dot_dimension_numbers<[1], [0], [0], [1], [0, 0, 1, 1], [], []>} : vector<16x128xbf16>, vector<128x128xbf16>, vector<16x128xf32> -> vector<16x128xf32>
    %c0_11 = arith.constant 0 : index
    %c0_12 = arith.constant 0 : index
    %17 = vector.load %arg5[%c0_11, %c0_12] : memref<1x128xf32, #tpu.memory_space<vmem>>, vector<1x128xf32>
    %18 = vector.broadcast %17 : vector<1x128xf32> to vector<16x128xf32>
    %19 = arith.addf %16, %18 : vector<16x128xf32>
    %c0_13 = arith.constant 0 : index
    %c0_14 = arith.constant 0 : index
    %20 = vector.load %arg6[%c0_13, %c0_14] : memref<16x128xf32, #tpu.memory_space<vmem>>, vector<16x128xf32>
    tpu.vector_store %arg6[%c0_13, %c0_14], %19 {strides = array<i32>} : memref<16x128xf32, #tpu.memory_space<vmem>>, vector<16x128xf32>,
    return
  }
  func.func @transform_0(%arg0: i32) -> (i32, i32) {
    %c0_i32 = arith.constant 0 : i32
    %c0_i32_0 = arith.constant 0 : i32
    return %arg0, %c0_i32 : i32, i32
  }
  func.func @transform_1(%arg0: i32) -> (i32, i32) {
    %c0_i32 = arith.constant 0 : i32
    %c0_i32_0 = arith.constant 0 : i32
    %c0_i32_1 = arith.constant 0 : i32
    return %c0_i32, %c0_i32_0 : i32, i32
  }
  func.func @transform_2(%arg0: i32) -> (i32, i32) {
    %c0_i32 = arith.constant 0 : i32
    %c0_i32_0 = arith.constant 0 : i32
    %c0_i32_1 = arith.constant 0 : i32
    return %c0_i32, %c0_i32_0 : i32, i32
  }
  func.func @transform_3(%arg0: i32) -> (i32, i32) {
    %c0_i32 = arith.constant 0 : i32
    %c0_i32_0 = arith.constant 0 : i32
    %c0_i32_1 = arith.constant 0 : i32
    return %c0_i32, %c0_i32_0 : i32, i32
  }
  func.func @transform_4(%arg0: i32) -> (i32, i32) {
    %c0_i32 = arith.constant 0 : i32
    %c0_i32_0 = arith.constant 0 : i32
    %c0_i32_1 = arith.constant 0 : i32
    return %c0_i32, %c0_i32_0 : i32, i32
  }
  func.func @transform_5(%arg0: i32) -> (i32, i32) {
    %c0_i32 = arith.constant 0 : i32
    %c0_i32_0 = arith.constant 0 : i32
    return %arg0, %c0_i32 : i32, i32
  }
}

</mosaic_0001>

<bundles_post_ra>
// kernel: mlp_forward_packed.1
= control target key start
LH: loop header
LB: loop body
LE: loop exit
PB: predicated region body
PF: predicated region fallthrough
CT: control target
= control target key end

     0   :  { %10 = vsyncpa [#allocation3], 0  ;;  %s527_s0 = inlined_call_operand.vmem [shape: bf16[16,128], index: 0, kind: input, shape index: {}]   ;;  %s528_s1 = inlined_call_operand.hbm [shape: bf16[128,128], index: 1, kind: input, shape index: {}]   ;;  %s529_s2 = inlined_call_operand.vmem [shape: f32[1,128], index: 2, kind: input, shape index: {}]   ;;  %s530_s3 = inlined_call_operand.hbm [shape: bf16[128,128], index: 3, kind: input, shape index: {}]   ;;  %s531_s4 = inlined_call_operand.vmem [shape: f32[1,128], index: 4, kind: input, shape index: {}]   ;;  %s532_s5 = inlined_call_operand.vmem [shape: f32[16,128], index: 5, kind: output, shape index: {}]  }
   0x1   :  { %11 = vsyncpa [#allocation5], 0  ;;  %s452_s18 = smov [#allocation2]   ;;  %s404_s22 = scalar_lea.hbm %s528_s1, 1024 }
   0x2   :  { %s19_s19 = sshll.u32 %s452_s18, 4  ;;  %p405_p0 = scmp.ne.s32.totalorder %s528_s1, %s404_s22  ;;  %s20_s19 = int_to_ptr.vmem [resolvable:$true] %s19_s19 }
   0x3   :  { %p408_p1 = scmp.lt.u32.totalorder %s404_s22, %s528_s1 }
   0x5   :  { %p410_p2 = pnand %p408_p1, %p405_p0 }
   0x7   :  { %413 = shalt.err (!%p410_p2)
}
   0x8   :  { %s414_s27 = scalar_lea.vmem %s20_s19, 1024  ;;  %p419_p4 = scmp.lt.s32.totalorder %s20_s19, %s20_s19 }
   0x9   :  { %p415_p3 = scmp.ne.s32.totalorder %s20_s19, %s414_s27  ;;  %p420_p5 = scmp.lt.s32.totalorder %s414_s27, %s414_s27 }
   0xb   :  { %p421_p6 = por %p420_p5, %p419_p4 }
   0xd   :  { %p422_p7 = pnand %p421_p6, %p415_p3 }
   0xf   :  { %425 = shalt.err (!%p422_p7)
}
  0x10   :  { %s453_s28 = smov 64   ;;  %s454_s29 = smov 4  }
  0x11   :  { %25 = dma.hbm_to_vmem [thread:$0]  %s528_s1, 1024, %s20_s19, [#allocation3], %s453_s28, %s453_s28, %s454_s29  }
  0x12   :  { %s455_s7 = smov [#allocation4]   ;;  %s426_s11 = scalar_lea.hbm %s530_s3, 1024 }
  0x13   :  { %s33_s8 = sshll.u32 %s455_s7, 4  ;;  %p427_p8 = scmp.ne.s32.totalorder %s530_s3, %s426_s11  ;;  %s34_s8 = int_to_ptr.vmem [resolvable:$true] %s33_s8 }
  0x14   :  { %p430_p9 = scmp.lt.u32.totalorder %s426_s11, %s530_s3 }
  0x16   :  { %p432_p10 = pnand %p430_p9, %p427_p8 }
  0x18   :  { %435 = shalt.err (!%p432_p10)
}
  0x19   :  { %s436_s16 = scalar_lea.vmem %s34_s8, 1024  ;;  %p441_p12 = scmp.lt.s32.totalorder %s34_s8, %s34_s8 }
  0x1a   :  { %p437_p11 = scmp.ne.s32.totalorder %s34_s8, %s436_s16  ;;  %p442_p13 = scmp.lt.s32.totalorder %s436_s16, %s436_s16 }
  0x1c   :  { %p443_p0 = por %p442_p13, %p441_p12 }
  0x1e   :  { %p444_p1 = pnand %p443_p0, %p437_p11 }
  0x20   :  { %447 = shalt.err (!%p444_p1)
}
  0x21   :  { %39 = dma.hbm_to_vmem [thread:$0]  %s530_s3, 1024, %s34_s8, [#allocation5], %s453_s28, %s453_s28, %s454_s29  }
  0x22   :  { %448 = dma.done.wait [#allocation3], 1024  }
  0x23   :  { %449 = vsyncadd [#allocation3], 4294966272 }
  0x24   :  { %450 = dma.done.wait [#allocation5], 1024  }
  0x25   :  { %451 = vsyncadd [#allocation5], 4294966272  ;;  %v456_v0 = vmov 0.0   ;;  %vm457_vm0 = vmmov 0   ;;  %v383_v1 = vld [vmem:[#allocation2] sm:$0xff]   ;;  %v384_v2 = vld [vmem:[#allocation2 + $0x8] sm:$0xff]  }
  0x26   :  { %337 = vmatprep.subr.bf16.mxu0 %v456_v0  ;;  %353 = vmatprep.mubr.msk.bf16.mxu0 %vm457_vm0, %v456_v0  ;;  %v385_v3 = vld [vmem:[#allocation2 + $0x10] sm:$0xff]   ;;  %v392_v4 = vld [vmem:[#allocation4] sm:$0xff]   ;;  %v386_v5 = vld [vmem:[#allocation2 + $0x18] sm:$0xff]  }
  0x27   :  { %357 = vmatprep.subr.bf16.mxu1 %v456_v0  ;;  %373 = vmatprep.mubr.msk.bf16.mxu1 %vm457_vm0, %v456_v0  ;;  %v393_v6 = vld [vmem:[#allocation4 + $0x8] sm:$0xff]   ;;  %v387_v7 = vld [vmem:[#allocation2 + $0x20] sm:$0xff]   ;;  %v389_v9 = vld [vmem:[#allocation2 + $0x30] sm:$0xff]  }
  0x28   :  { %338 = vmatpush3.bf16.msra.mxu0 %v383_v1  ;;  %358 = vmatpush3.bf16.msra.mxu1 %v392_v4  ;;  %v388_v8 = vld [vmem:[#allocation2 + $0x28] sm:$0xff]   ;;  %v390_v10 = vld [vmem:[#allocation2 + $0x38] sm:$0xff]   ;;  %v391_v11 = vld [vmem:[%s527_s0] sm:$0xff]  }
  0x29   :  { %339 = vmatprep.subr.bf16.mxu0 %v456_v0  ;;  %359 = vmatprep.subr.bf16.mxu1 %v456_v0  ;;  %v394_v12 = vld [vmem:[#allocation4 + $0x10] sm:$0xff]   ;;  %v395_v13 = vld [vmem:[#allocation4 + $0x18] sm:$0xff]   ;;  %v396_v14 = vld [vmem:[#allocation4 + $0x20] sm:$0xff]  }
  0x2a   :  { %v397_v15 = vld [vmem:[#allocation4 + $0x28] sm:$0xff]   ;;  %v398_v16 = vld [vmem:[#allocation4 + $0x30] sm:$0xff]   ;;  %v399_v17 = vld [vmem:[#allocation4 + $0x38] sm:$0xff]  }
  0x2b   :  { %v300_v18 = vld [vmem:[%s529_s2] ss:$0 sm:$0xff] }
  0x2c   :  { %340 = vmatpush3.bf16.msra.mxu0 %v384_v2  ;;  %360 = vmatpush3.bf16.msra.mxu1 %v393_v6  ;;  %v310_v36 = vld [vmem:[%s531_s4] ss:$0 sm:$0xff] }
  0x2d   :  { %341 = vmatprep.subr.bf16.mxu0 %v456_v0  ;;  %361 = vmatprep.subr.bf16.mxu1 %v456_v0 }
  0x30   :  { %342 = vmatpush3.bf16.msra.mxu0 %v385_v3  ;;  %362 = vmatpush3.bf16.msra.mxu1 %v394_v12 }
  0x31   :  { %343 = vmatprep.subr.bf16.mxu0 %v456_v0  ;;  %363 = vmatprep.subr.bf16.mxu1 %v456_v0 }
  0x34   :  { %344 = vmatpush3.bf16.msra.mxu0 %v386_v5  ;;  %364 = vmatpush3.bf16.msra.mxu1 %v395_v13 }
  0x35   :  { %345 = vmatprep.subr.bf16.mxu0 %v456_v0  ;;  %365 = vmatprep.subr.bf16.mxu1 %v456_v0 }
  0x38   :  { %346 = vmatpush3.bf16.msra.mxu0 %v387_v7  ;;  %366 = vmatpush3.bf16.msra.mxu1 %v396_v14 }
  0x39   :  { %347 = vmatprep.subr.bf16.mxu0 %v456_v0  ;;  %367 = vmatprep.subr.bf16.mxu1 %v456_v0 }
  0x3c   :  { %348 = vmatpush3.bf16.msra.mxu0 %v388_v8  ;;  %368 = vmatpush3.bf16.msra.mxu1 %v397_v15 }
  0x3d   :  { %349 = vmatprep.subr.bf16.mxu0 %v456_v0  ;;  %369 = vmatprep.subr.bf16.mxu1 %v456_v0 }
  0x40   :  { %350 = vmatpush3.bf16.msra.mxu0 %v389_v9  ;;  %370 = vmatpush3.bf16.msra.mxu1 %v398_v16 }
  0x41   :  { %351 = vmatprep.subr.bf16.mxu0 %v456_v0  ;;  %371 = vmatprep.subr.bf16.mxu1 %v456_v0 }
  0x44   :  { %352 = vmatpush3.bf16.msra.mxu0 %v390_v10  ;;  %372 = vmatpush3.bf16.msra.mxu1 %v399_v17 }
  0x47   :  { %354 = vmatmul.mubr.bf16.vlgmr.msra.gmra.mrb[0].mxu0 %v391_v11 }
 0x11a   :  { %v162_v19 = vpop.f32.mrb[0].mxu0 }
 0x11b   :  { %v163_v20 = vadd.f32 %v300_v18, %v162_v19  ;;  %v355_v21 = vpop.f32.mrb[1].mxu0 }
 0x11c   :  { %v165_v22 = vpop.f32.mrb[2].mxu0 }
 0x11d   :  { %v171_v23 = vmul.f32 0.70710677, %v163_v20  ;;  %v166_v24 = vadd.f32 %v300_v18, %v165_v22  ;;  %v356_v25 = vpop.f32.mrb[3].mxu0  ;;  %v169_v30 = vmul.f32 0.5, %v163_v20 }
 0x11f   :  { %400 = verf.f32 %v171_v23  ;;  %v172_v26 = vmul.f32 0.70710677, %v166_v24  ;;  %v170_v31 = vmul.f32 0.5, %v166_v24 }
 0x121   :  { %402 = verf.f32 %v172_v26 }
 0x129   :  { %v401_v27 = vpop.eup %400 }
 0x12a   :  { %v175_v28 = vadd.f32 1.0, %v401_v27 }
 0x12b   :  { %v403_v29 = vpop.eup %402 }
 0x12c   :  { %v176_v32 = vadd.f32 1.0, %v403_v29  ;;  %v177_v33 = vmul.f32 %v175_v28, %v169_v30 }
 0x12e   :  { %v178_v34 = vmul.f32 %v176_v32, %v170_v31 }
 0x130   :  { %v179_v35 = vpack.c.bf16 %v178_v34, %v177_v33 }
 0x132   :  { %374 = vmatmul.mubr.bf16.vlgmr.msra.gmra.mrb[0].mxu1 %v179_v35 }
 0x205   :  { %v285_v37 = vpop.f32.mrb[0].mxu1 }
 0x206   :  { %v286_v38 = vadd.f32 %v310_v36, %v285_v37  ;;  %v375_v39 = vpop.f32.mrb[1].mxu1 }
 0x207   :  { %v288_v40 = vpop.f32.mrb[2].mxu1 }
 0x208   :  { %292 = vst [vmem:[%s532_s5] sm:$0xff] %v286_v38  ;;  %v289_v41 = vadd.f32 %v310_v36, %v288_v40  ;;  %v376_v42 = vpop.f32.mrb[3].mxu1 }
 0x20a   :  { %293 = vst [vmem:[%s532_s5 + $0x8] sm:$0xff] %v289_v41 }
 0x20b   :  { %298 = vsyncpa [#allocation3], 1 }
 0x20c   :  { %299 = vsyncpa [#allocation5], 1 }

</bundles_post_ra>
